<compile_context>
chip_gen: v7x
topology: tpu7x:2x2x1
jax: 0.10.0
libtpu: 0.0.40
codegen_flags: <defaults>
</compile_context>

<pallas_src>
import jax
import jax.numpy as jnp
from jax.experimental import pallas as pl
from jax.experimental.pallas import tpu as pltpu

H = 128  # hidden width fixed by the module


def _round_up(x, m):
    return (x + m - 1) // m * m


def _pick_block_b(B, D, x_itemsize, compute_itemsize,
                  vmem_budget=8 * 1024 * 1024, max_block=4096):
    """Largest 128-multiple batch tile whose working set fits the smallest
    (v5e, 16 MiB) scoped-VMEM default with headroom.  The x tile is
    lane-padded to 128 lanes in VMEM, so budget per row uses round_up(D,128)."""
    lanes = _round_up(max(D, 1), 128)
    per_row = (2 * lanes * x_itemsize        # double-buffered x tile
               + 3 * H * 4                   # h1 / h2 / misc f32 intermediates
               + 2 * H * compute_itemsize    # low-precision copies fed to MXU
               + 2 * 4)                      # double-buffered output row
    fixed = 256 * 1024                       # resident weights / biases / slack
    bb = max(128, (vmem_budget - fixed) // per_row)
    bb = min(int(bb), max_block)
    bb = (bb // 128) * 128
    return max(128, bb)


def mlp_kernel(x_ref, w1_ref, b1_ref, w2_ref, b2_ref, w3t_ref, b3_ref, o_ref):
    # Cast after the load (no extra HBM pass in the wrapper); no-op when the
    # caller already supplies x in the compute dtype.
    x = x_ref[...].astype(w1_ref.dtype)

    # Layer 1: Linear(D,128) + ReLU  (MXU, f32 accumulate; bias/ReLU in f32).
    h1 = jnp.dot(x, w1_ref[...], preferred_element_type=jnp.float32)
    h1 = jnp.maximum(h1 + b1_ref[...], 0.0)

    # Layer 2: Linear(128,128) + ReLU.
    h2 = jnp.dot(h1.astype(w2_ref.dtype), w2_ref[...],
                 preferred_element_type=jnp.float32)
    h2 = jnp.maximum(h2 + b2_ref[...], 0.0)

    # Layer 3: Linear(128,1).  h2 (block_b,128) @ W3^T (128,1) is the natural
    # MXU operand layout (no per-step h2 transpose through the XLU); only the
    # (block_b,1) result column is relaid out to the lane-dense (1,block_b)
    # output row.
    z_col = jnp.dot(h2.astype(w3t_ref.dtype), w3t_ref[...],
                    preferred_element_type=jnp.float32)        # (block_b, 1)
    z = z_col.T + b3_ref[0, 0]                                  # (1, block_b)

    # Sigmoid epilogue in f32.  exp + exact reciprocal (EUP has slack).
    o_ref[...] = pl.reciprocal(1.0 + jnp.exp(-z), approx=False).astype(o_ref.dtype)


def reward_network_forward(x, params, *, block_b=None, compute_dtype=jnp.bfloat16):
    """x: [B, D]. params: dict of w1,b1,w2,b2,w3,b3 (see init_params).

    compute_dtype: dtype of the MXU matmul operands (bf16 default; pass
    jnp.float32 for exact-precision matmuls).  Accumulation and all
    elementwise math are f32 regardless.
    """
    B, D = x.shape
    assert params["w1"].shape == (D, H)

    if block_b is None:
        block_b = _pick_block_b(B, D, x.dtype.itemsize,
                                jnp.dtype(compute_dtype).itemsize)
    else:
        block_b = max(128, _round_up(block_b, 128))
    block_b = min(block_b, _round_up(B, 128))          # don't exceed the batch
    if B >= 256:
        # Guarantee >=2 grid tiles so v7x's two TensorCores both get work.
        block_b = min(block_b, _round_up(pl.cdiv(B, 2), 128))

    num_tiles = pl.cdiv(B, block_b)
    B_out = num_tiles * block_b        # lane-dense padded output row width

    # One-off tiny weight casts (DMA'd once, VMEM-resident via constant
    # index_maps).  x itself is never padded/cast/copied in the wrapper.
    w1 = params["w1"].astype(compute_dtype)
    w2 = params["w2"].astype(compute_dtype)
    w3t = params["w3"].reshape(H, 1).astype(compute_dtype)     # (1,H) -> (H,1)
    b1 = params["b1"].astype(jnp.float32)
    b2 = params["b2"].astype(jnp.float32)
    b3 = params["b3"].astype(jnp.float32)                      # (1,1) scalar

    cost = pl.CostEstimate(
        flops=2 * B_out * (D * H + H * H + H),
        transcendentals=B_out,
        bytes_accessed=(x.size * x.dtype.itemsize
                        + (w1.size + w2.size + w3t.size) * jnp.dtype(compute_dtype).itemsize
                        + (b1.size + b2.size + b3.size) * 4
                        + B_out * 4),
    )

    out_row = pl.pallas_call(
        mlp_kernel,
        out_shape=jax.ShapeDtypeStruct((1, B_out), jnp.float32),
        grid_spec=pltpu.PrefetchScalarGridSpec(
            num_scalar_prefetch=0,
            grid=(num_tiles,),
            in_specs=[
                pl.BlockSpec((block_b, D), lambda i: (i, 0)),       # x (streams)
                pl.BlockSpec((D, H), lambda i: (0, 0)),             # W1 resident
                pl.BlockSpec((1, H), lambda i: (0, 0)),             # b1
                pl.BlockSpec((H, H), lambda i: (0, 0)),             # W2
                pl.BlockSpec((1, H), lambda i: (0, 0)),             # b2
                pl.BlockSpec((H, 1), lambda i: (0, 0)),             # W3^T column
                pl.BlockSpec(memory_space=pltpu.MemorySpace.SMEM),  # b3 scalar
            ],
            out_specs=pl.BlockSpec((1, block_b), lambda i: (0, i)),
        ),
        # "parallel" batch axis; on v7x consider pltpu.CORE_PARALLEL to force
        # cross-TensorCore sharding of the grid.
        compiler_params=pltpu.CompilerParams(
            dimension_semantics=("parallel",)),
        cost_estimate=cost,
    )(x, w1, b1, w2, b2, w3t, b3)

    return out_row.reshape(-1)[:B].reshape(B, 1)


def init_params(key, input_dim, hidden=H):
    """Deterministic synthetic parameters (shapes match the nn.Module)."""
    k1, k2, k3, k4, k5, k6 = jax.random.split(key, 6)
    s1 = 1.0 / jnp.sqrt(input_dim)
    s2 = 1.0 / jnp.sqrt(hidden)
    return {
        # layers 1/2 stored as [in, out]; layer 3 as the torch-native (1, H) row
        "w1": jax.random.uniform(k1, (input_dim, hidden), jnp.float32, -s1, s1),
        "b1": jax.random.uniform(k2, (1, hidden), jnp.float32, -s1, s1),
        "w2": jax.random.uniform(k3, (hidden, hidden), jnp.float32, -s2, s2),
        "b2": jax.random.uniform(k4, (1, hidden), jnp.float32, -s2, s2),
        "w3": jax.random.uniform(k5, (1, hidden), jnp.float32, -s2, s2),
        "b3": jax.random.uniform(k6, (1, 1), jnp.float32, -s2, s2),
    }


def reference_forward(x, p):
    h1 = jnp.maximum(x @ p["w1"] + p["b1"], 0.0)
    h2 = jnp.maximum(h1 @ p["w2"] + p["b2"], 0.0)
    return jax.nn.sigmoid(h2 @ p["w3"].T + p["b3"])


if __name__ == "__main__":
    key = jax.random.PRNGKey(0)
    kx1, kx2, kx3, kx4, kp = jax.random.split(key, 5)

    D = 16
    params = init_params(kp, D)

    # 1) Small batch: single 128-wide (lane-dense) tile, partial input block.
    x_small = jax.random.normal(kx1, (8, D), jnp.float32)
    ref_small = reference_forward(x_small, params)
    out_f32 = jax.block_until_ready(
        reward_network_forward(x_small, params, compute_dtype=jnp.float32))
    assert out_f32.shape == (8, 1)
    assert jnp.allclose(out_f32, ref_small, atol=2e-3, rtol=2e-3), "f32 mismatch (small)"

    # 2) B not a multiple of the tile, default bf16 matmul operands.
    x_mid = jax.random.normal(kx2, (130, D), jnp.float32)
    ref_mid = reference_forward(x_mid, params)
    out_mid = jax.block_until_ready(reward_network_forward(x_mid, params))
    assert out_mid.shape == (130, 1)
    assert jnp.allclose(out_mid, ref_mid, atol=3e-2, rtol=3e-2), "bf16 mismatch (mid)"

    # 3) Explicit small tile -> multi-tile grid with a partial last block.
    x_tiled = jax.random.normal(kx3, (300, D), jnp.float32)
    ref_tiled = reference_forward(x_tiled, params)
    out_tiled = jax.block_until_ready(
        reward_network_forward(x_tiled, params, block_b=128,
                               compute_dtype=jnp.float32))
    assert out_tiled.shape == (300, 1)
    assert jnp.allclose(out_tiled, ref_tiled, atol=2e-3, rtol=2e-3), "f32 mismatch (tiled)"

    # 4) Larger batch: auto tile, >=2 grid tiles (v7x megacore path),
    #    bf16 x supplied upstream (fast DMA path, no wrapper cast).
    x_large = jax.random.normal(kx4, (2048, D), jnp.float32)
    ref_large = reference_forward(x_large, params)
    out_large = jax.block_until_ready(
        reward_network_forward(x_large.astype(jnp.bfloat16), params))
    assert out_large.shape == (2048, 1)
    assert jnp.allclose(out_large, ref_large, atol=3e-2, rtol=3e-2), "bf16 mismatch (large)"

    print("KERNEL_OK")
</pallas_src>

<mosaic_0001>
module attributes {stable_mosaic.version = 11 : i64} {
  func.func @mlp_kernel(%arg0: i32, %arg1: memref<128x16xf32, #tpu.memory_space<vmem>>, %arg2: memref<16x128xf32, #tpu.memory_space<vmem>>, %arg3: memref<1x128xf32, #tpu.memory_space<vmem>>, %arg4: memref<128x128xf32, #tpu.memory_space<vmem>>, %arg5: memref<1x128xf32, #tpu.memory_space<vmem>>, %arg6: memref<128x1xf32, #tpu.memory_space<vmem>>, %arg7: memref<1x1xf32, #tpu.memory_space<smem>>, %arg8: memref<1x128xf32, #tpu.memory_space<vmem>>) attributes {dimension_semantics = [#tpu.dimension_semantics<parallel>], iteration_bounds = array<i64: 1>, scalar_prefetch = 0 : i64, scratch_operands = 0 : i64, tpu.core_type = #tpu.core_type<tc>, window_params = [{transform_indices = @transform_0, window_bounds = array<i64: 128, 16>}, {pipeline_mode = #tpu.pipeline_mode<synchronous>, transform_indices = @transform_1, window_bounds = array<i64: 16, 128>}, {pipeline_mode = #tpu.pipeline_mode<synchronous>, transform_indices = @transform_2, window_bounds = array<i64: 1, 128>}, {pipeline_mode = #tpu.pipeline_mode<synchronous>, transform_indices = @transform_3, window_bounds = array<i64: 128, 128>}, {pipeline_mode = #tpu.pipeline_mode<synchronous>, transform_indices = @transform_4, window_bounds = array<i64: 1, 128>}, {pipeline_mode = #tpu.pipeline_mode<synchronous>, transform_indices = @transform_5, window_bounds = array<i64: 128, 1>}, {transform_indices = @transform_6, window_bounds = array<i64: 1, 1>}, {transform_indices = @transform_7, window_bounds = array<i64: 1, 128>}]} {
    %c0 = arith.constant 0 : index
    %c0_0 = arith.constant 0 : index
    %0 = vector.load %arg1[%c0, %c0_0] : memref<128x16xf32, #tpu.memory_space<vmem>>, vector<128x16xf32>
    %c0_1 = arith.constant 0 : index
    %c0_2 = arith.constant 0 : index
    %1 = vector.load %arg2[%c0_1, %c0_2] : memref<16x128xf32, #tpu.memory_space<vmem>>, vector<16x128xf32>
    %cst = arith.constant dense<0.000000e+00> : vector<128x128xf32>
    %2 = tpu.matmul %0, %1, %cst {dimension_numbers = #tpu.dot_dimension_numbers<[1], [0], [0], [1], [0, 0, 1, 1], [], []>} : vector<128x16xf32>, vector<16x128xf32>, vector<128x128xf32> -> vector<128x128xf32>
    %c0_3 = arith.constant 0 : index
    %c0_4 = arith.constant 0 : index
    %3 = vector.load %arg3[%c0_3, %c0_4] : memref<1x128xf32, #tpu.memory_space<vmem>>, vector<1x128xf32>
    %4 = vector.broadcast %3 : vector<1x128xf32> to vector<128x128xf32>
    %5 = arith.addf %2, %4 : vector<128x128xf32>
    %cst_5 = arith.constant 0.000000e+00 : f32
    %6 = vector.broadcast %cst_5 : f32 to vector<128x128xf32>
    %7 = arith.maximumf %5, %6 : vector<128x128xf32>
    %c0_6 = arith.constant 0 : index
    %c0_7 = arith.constant 0 : index
    %8 = vector.load %arg4[%c0_6, %c0_7] : memref<128x128xf32, #tpu.memory_space<vmem>>, vector<128x128xf32>
    %cst_8 = arith.constant dense<0.000000e+00> : vector<128x128xf32>
    %9 = tpu.matmul %7, %8, %cst_8 {dimension_numbers = #tpu.dot_dimension_numbers<[1], [0], [0], [1], [0, 0, 1, 1], [], []>} : vector<128x128xf32>, vector<128x128xf32>, vector<128x128xf32> -> vector<128x128xf32>
    %c0_9 = arith.constant 0 : index
    %c0_10 = arith.constant 0 : index
    %10 = vector.load %arg5[%c0_9, %c0_10] : memref<1x128xf32, #tpu.memory_space<vmem>>, vector<1x128xf32>
    %11 = vector.broadcast %10 : vector<1x128xf32> to vector<128x128xf32>
    %12 = arith.addf %9, %11 : vector<128x128xf32>
    %cst_11 = arith.constant 0.000000e+00 : f32
    %13 = vector.broadcast %cst_11 : f32 to vector<128x128xf32>
    %14 = arith.maximumf %12, %13 : vector<128x128xf32>
    %c0_12 = arith.constant 0 : index
    %c0_13 = arith.constant 0 : index
    %15 = vector.load %arg6[%c0_12, %c0_13] : memref<128x1xf32, #tpu.memory_space<vmem>>, vector<128x1xf32>
    %cst_14 = arith.constant dense<0.000000e+00> : vector<128x1xf32>
    %16 = tpu.matmul %14, %15, %cst_14 {dimension_numbers = #tpu.dot_dimension_numbers<[1], [0], [0], [1], [0, 0, 1, 1], [], []>} : vector<128x128xf32>, vector<128x1xf32>, vector<128x1xf32> -> vector<128x1xf32>
    %17 = tpu.transpose %16, [1, 0] : vector<128x1xf32> -> vector<1x128xf32>
    %c0_15 = arith.constant 0 : index
    %c0_16 = arith.constant 0 : index
    %18 = memref.load %arg7[%c0_15, %c0_16] : memref<1x1xf32, #tpu.memory_space<smem>>
    %19 = vector.broadcast %18 : f32 to vector<1x128xf32>
    %20 = arith.addf %17, %19 : vector<1x128xf32>
    %cst_17 = arith.constant 0.000000e+00 : f32
    %21 = vector.broadcast %cst_17 : f32 to vector<1x128xf32>
    %22 = arith.subf %21, %20 : vector<1x128xf32>
    %23 = math.exp %22 : vector<1x128xf32>
    %cst_18 = arith.constant 1.000000e+00 : f32
    %24 = vector.broadcast %cst_18 : f32 to vector<1x128xf32>
    %25 = arith.addf %24, %23 : vector<1x128xf32>
    %26 = tpu.reciprocal %25 : vector<1x128xf32> -> vector<1x128xf32>
    %c0_19 = arith.constant 0 : index
    %c0_20 = arith.constant 0 : index
    %27 = vector.load %arg8[%c0_19, %c0_20] : memref<1x128xf32, #tpu.memory_space<vmem>>, vector<1x128xf32>
    tpu.vector_store %arg8[%c0_19, %c0_20], %26 {strides = array<i32>} : memref<1x128xf32, #tpu.memory_space<vmem>>, vector<1x128xf32>,
    return
  }
  func.func @transform_0(%arg0: i32) -> (i32, i32) {
    %c0_i32 = arith.constant 0 : i32
    %c0_i32_0 = arith.constant 0 : i32
    return %arg0, %c0_i32 : i32, i32
  }
  func.func @transform_1(%arg0: i32) -> (i32, i32) {
    %c0_i32 = arith.constant 0 : i32
    %c0_i32_0 = arith.constant 0 : i32
    %c0_i32_1 = arith.constant 0 : i32
    return %c0_i32, %c0_i32_0 : i32, i32
  }
  func.func @transform_2(%arg0: i32) -> (i32, i32) {
    %c0_i32 = arith.constant 0 : i32
    %c0_i32_0 = arith.constant 0 : i32
    %c0_i32_1 = arith.constant 0 : i32
    return %c0_i32, %c0_i32_0 : i32, i32
  }
  func.func @transform_3(%arg0: i32) -> (i32, i32) {
    %c0_i32 = arith.constant 0 : i32
    %c0_i32_0 = arith.constant 0 : i32
    %c0_i32_1 = arith.constant 0 : i32
    return %c0_i32, %c0_i32_0 : i32, i32
  }
  func.func @transform_4(%arg0: i32) -> (i32, i32) {
    %c0_i32 = arith.constant 0 : i32
    %c0_i32_0 = arith.constant 0 : i32
    %c0_i32_1 = arith.constant 0 : i32
    return %c0_i32, %c0_i32_0 : i32, i32
  }
  func.func @transform_5(%arg0: i32) -> (i32, i32) {
    %c0_i32 = arith.constant 0 : i32
    %c0_i32_0 = arith.constant 0 : i32
    %c0_i32_1 = arith.constant 0 : i32
    return %c0_i32, %c0_i32_0 : i32, i32
  }
  func.func @transform_6(%arg0: i32) -> (i32, i32) {
    %c0_i32 = arith.constant 0 : i32
    %c0_i32_0 = arith.constant 0 : i32
    %c0_i32_1 = arith.constant 0 : i32
    return %c0_i32, %c0_i32_0 : i32, i32
  }
  func.func @transform_7(%arg0: i32) -> (i32, i32) {
    %c0_i32 = arith.constant 0 : i32
    %c0_i32_0 = arith.constant 0 : i32
    return %c0_i32, %arg0 : i32, i32
  }
}

</mosaic_0001>

<bundles_post_ra>
// kernel: tpu_custom_call.1
= control target key start
LH: loop header
LB: loop body
LE: loop exit
PB: predicated region body
PF: predicated region fallthrough
CT: control target
= control target key end

     0   :  { %13 = vsyncpa [#allocation4], 0  ;;  %s1285_s0 = inlined_call_operand.hbm [shape: f32[8,16], index: 0, kind: input, shape index: {}]   ;;  %s1286_s1 = inlined_call_operand.vmem [shape: f32[16,128], index: 1, kind: input, shape index: {}]   ;;  %s1287_s2 = inlined_call_operand.hbm [shape: f32[1,128], index: 2, kind: input, shape index: {}]   ;;  %s1288_s3 = inlined_call_operand.vmem [shape: f32[128,128], index: 3, kind: input, shape index: {}]   ;;  %s1289_s4 = inlined_call_operand.vmem [shape: f32[1,128], index: 4, kind: input, shape index: {}]   ;;  %s1290_s5 = inlined_call_operand.vmem [shape: f32[128,1], index: 5, kind: input, shape index: {}]   ;;  %s1291_s6 = inlined_call_operand.<no memory space> [shape: f32[1,1], index: 6, kind: input, shape index: {}]   ;;  %s1292_s7 = inlined_call_operand.hbm [shape: f32[1,128], index: 7, kind: output, shape index: {}]  }
   0x1   :  { %14 = vsyncpa [#allocation7], 0 }
   0x2   :  { %15 = vsyncpa [#allocation5], 0 }
   0x3   :  { %20 = vsyncadd [#allocation4], 1920  ;;  %s1080_s24 = smov [#allocation3]   ;;  %s1008_s28 = scalar_lea.hbm %s1285_s0, 128 }
   0x4   :  { %s21_s25 = sshll.u32 %s1080_s24, 4  ;;  %p1009_p0 = scmp.ne.s32.totalorder %s1285_s0, %s1008_s28  ;;  %s22_s25 = int_to_ptr.vmem [resolvable:$true] %s21_s25 }
   0x5   :  { %p1012_p1 = scmp.lt.u32.totalorder %s1008_s28, %s1285_s0 }
   0x7   :  { %p1014_p2 = pnand %p1012_p1, %p1009_p0 }
   0x9   :  { %1017 = shalt.err (!%p1014_p2)
}
   0xa   :  { %s1018_s10 = scalar_lea.vmem %s22_s25, 128  ;;  %s1022_s11 = scalar_lea.vmem %s22_s25, 2048 }
   0xb   :  { %p1019_p3 = scmp.ne.s32.totalorder %s22_s25, %s1018_s10  ;;  %p1023_p4 = scmp.lt.s32.totalorder %s22_s25, %s22_s25 }
   0xc   :  { %p1024_p5 = scmp.lt.s32.totalorder %s1022_s11, %s1018_s10 }
   0xe   :  { %p1025_p6 = por %p1024_p5, %p1023_p4 }
  0x10   :  { %p1026_p7 = pnand %p1025_p6, %p1019_p3 }
  0x12   :  { %1029 = shalt.err (!%p1026_p7)
}
  0x13   :  { %s1081_s12 = smov 128   ;;  %s1082_s13 = smov 8  }
  0x14   :  { %27 = dma.hbm_to_vmem [thread:$0]  %s1285_s0, 128, %s22_s25, [#allocation4], %s1081_s12, %s1081_s12, %s1082_s13  }
  0x15   :  { %s1083_s16 = smov [#allocation6]   ;;  %s1030_s20 = scalar_lea.hbm %s1287_s2, 16 }
  0x16   :  { %s36_s17 = sshll.u32 %s1083_s16, 4  ;;  %p1031_p8 = scmp.ne.s32.totalorder %s1287_s2, %s1030_s20  ;;  %s37_s17 = int_to_ptr.vmem [resolvable:$true] %s36_s17 }
  0x17   :  { %p1034_p9 = scmp.lt.u32.totalorder %s1030_s20, %s1287_s2 }
  0x19   :  { %p1036_p10 = pnand %p1034_p9, %p1031_p8 }
  0x1b   :  { %1039 = shalt.err (!%p1036_p10)
}
  0x1c   :  { %s1040_s26 = scalar_lea.vmem %s37_s17, 16  ;;  %s1044_s0 = scalar_lea.vmem %s37_s17, 32 }
  0x1d   :  { %p1041_p11 = scmp.ne.s32.totalorder %s37_s17, %s1040_s26  ;;  %p1045_p12 = scmp.lt.s32.totalorder %s37_s17, %s37_s17 }
  0x1e   :  { %p1046_p13 = scmp.lt.s32.totalorder %s1044_s0, %s1040_s26 }
  0x20   :  { %p1047_p0 = por %p1046_p13, %p1045_p12 }
  0x22   :  { %p1048_p1 = pnand %p1047_p0, %p1041_p11 }
  0x24   :  { %1051 = shalt.err (!%p1048_p1)
}
  0x25   :  { %39 = dma.hbm_to_vmem [thread:$0]  %s1287_s2, 16, %s37_s17, [#allocation7]  }
  0x26   :  { %1074 = dma.done.wait [#allocation4], 2048  }
  0x27   :  { %1075 = vsyncadd [#allocation4], 4294965248 }
  0x28   :  { %1076 = dma.done.wait [#allocation7], 16  }
  0x29   :  { %1077 = vsyncadd [#allocation7], 4294967280  ;;  %vm79_vm0 = vcmask 130048   ;;  %v70_v0 = vld [vmem:[%s1286_s1] sm:$0xff]  ;;  %v71_v1 = vld [vmem:[%s1286_s1 + $0x8] sm:$0xff]  ;;  %s1084_s20 = smov [#allocation8]  }
  0x2a   :  { %v54_v2 = vld [vmem:[#allocation3] sm:$0xff]  ;;  %v931_v3 = vpack.c.bf16 %v71_v1, %v70_v0  ;;  %v55_v4 = vld [vmem:[#allocation3 + $0x8] sm:$0xff]  ;;  %v56_v5 = vld [vmem:[#allocation3 + $0x10] sm:$0xff] }
  0x2b   :  { %795 = vmatprep.mubr.msk.f32.mxu0 %vm79_vm0, %v54_v2  ;;  %v289_v6 = vld [vmem:[%s1288_s3] sm:$0xff]  ;;  %v290_v7 = vld [vmem:[%s1288_s3 + $0x8] sm:$0xff]  ;;  %v291_v8 = vld [vmem:[%s1288_s3 + $0x10] sm:$0xff] }
  0x2c   :  { %932 = vmatprep.subr.bf16.mxu0 %v931_v3  ;;  %v935_v9 = vpack.c.bf16 %v290_v7, %v289_v6  ;;  %v292_v10 = vld [vmem:[%s1288_s3 + $0x18] sm:$0xff]  ;;  %v293_v13 = vld [vmem:[%s1288_s3 + $0x20] sm:$0xff]  ;;  %v294_v14 = vld [vmem:[%s1288_s3 + $0x28] sm:$0xff] }
  0x2d   :  { %934 = vmatpush3.bf16.msra.mxu0 %v931_v3  ;;  %v57_v11 = vld [vmem:[#allocation3 + $0x18] sm:$0xff]  ;;  %v939_v12 = vpack.c.bf16 %v292_v10, %v291_v8  ;;  %v58_v15 = vld [vmem:[#allocation3 + $0x20] sm:$0xff]  ;;  %v943_v16 = vpack.c.bf16 %v294_v14, %v293_v13  ;;  %v59_v17 = vld [vmem:[#allocation3 + $0x28] sm:$0xff] }
  0x2e   :  { %936 = vmatprep.subr.bf16.mxu1 %v935_v9  ;;  %v295_v18 = vld [vmem:[%s1288_s3 + $0x30] sm:$0xff]  ;;  %v296_v19 = vld [vmem:[%s1288_s3 + $0x38] sm:$0xff]  ;;  %v297_v23 = vld [vmem:[%s1288_s3 + $0x40] sm:$0xff] }
  0x2f   :  { %938 = vmatpush3.bf16.msra.mxu1 %v935_v9  ;;  %v60_v20 = vld [vmem:[#allocation3 + $0x30] sm:$0xff]  ;;  %v947_v21 = vpack.c.bf16 %v296_v19, %v295_v18  ;;  %v61_v22 = vld [vmem:[#allocation3 + $0x38] sm:$0xff]  ;;  %v298_v24 = vld [vmem:[%s1288_s3 + $0x48] sm:$0xff] }
  0x30   :  { %796 = vmatmul.mubr.msk.f32.vlgmr.msra.gmra.mrb[0].mxu0 %vm79_vm0, %v55_v4  ;;  %940 = vmatprep.subr.bf16.mxu1 %v939_v12  ;;  %v62_v25 = vld [vmem:[#allocation3 + $0x40] sm:$0xff]  ;;  %v951_v26 = vpack.c.bf16 %v298_v24, %v297_v23  ;;  %v63_v27 = vld [vmem:[#allocation3 + $0x48] sm:$0xff]  ;;  %v299_v28 = vld [vmem:[%s1288_s3 + $0x50] sm:$0xff] }
  0x31   :  { %798 = vmatprep.mubr.msk.f32.mxu0 %vm79_vm0, %v56_v5  ;;  %v300_v29 = vld [vmem:[%s1288_s3 + $0x58] sm:$0xff]  ;;  %v64_v30 = vld [vmem:[#allocation3 + $0x50] sm:$0xff]  ;;  %v301_v33 = vld [vmem:[%s1288_s3 + $0x60] sm:$0xff] }
  0x32   :  { %v955_v31 = vpack.c.bf16 %v300_v29, %v299_v28  ;;  %v65_v32 = vld [vmem:[#allocation3 + $0x58] sm:$0xff]  ;;  %v302_v34 = vld [vmem:[%s1288_s3 + $0x68] sm:$0xff]  ;;  %v66_v35 = vld [vmem:[#allocation3 + $0x60] sm:$0xff] }
  0x33   :  { %942 = vmatpush3.bf16.msra.mxu1 %v939_v12  ;;  %v959_v36 = vpack.c.bf16 %v302_v34, %v301_v33  ;;  %v67_v37 = vld [vmem:[#allocation3 + $0x68] sm:$0xff]  ;;  %v68_v38 = vld [vmem:[#allocation3 + $0x70] sm:$0xff]  ;;  %v69_v39 = vld [vmem:[#allocation3 + $0x78] sm:$0xff] }
  0x34   :  { %799 = vmatmul.mubr.msk.f32.gmra.mrb[2].mxu0 %vm79_vm0, %v57_v11  ;;  %944 = vmatprep.subr.bf16.mxu1 %v943_v16  ;;  %v303_v40 = vld [vmem:[%s1288_s3 + $0x70] sm:$0xff]  ;;  %v304_v41 = vld [vmem:[%s1288_s3 + $0x78] sm:$0xff]  ;;  %v473_v43 = vld [vmem:[%s1290_s5] sm:$0xff]  ;;  %s681_s3 = sshll.u32 %s1084_s20, 4  ;;  %s682_s3 = int_to_ptr.vmem [resolvable:$true] %s681_s3 }
  0x35   :  { %801 = vmatprep.mubr.msk.f32.mxu0 %vm79_vm0, %v58_v15  ;;  %v963_v42 = vpack.c.bf16 %v304_v41, %v303_v40  ;;  %v474_v44 = vld [vmem:[%s1290_s5 + $0x8] sm:$0xff]  ;;  %v475_v45 = vld [vmem:[%s1290_s5 + $0x10] sm:$0xff]  ;;  %v476_v47 = vld [vmem:[%s1290_s5 + $0x18] sm:$0xff]  ;;  %s1052_s21 = scalar_lea.vmem %s682_s3, 16  ;;  %s1056_s22 = scalar_lea.vmem %s682_s3, 32 }
  0x36   :  { %v967_v46 = vpack.c.bf16 %v474_v44, %v473_v43  ;;  %v971_v48 = vpack.c.bf16 %v476_v47, %v475_v45  ;;  %v477_v49 = vld [vmem:[%s1290_s5 + $0x20] sm:$0xff]  ;;  %v478_v50 = vld [vmem:[%s1290_s5 + $0x28] sm:$0xff]  ;;  %v479_v52 = vld [vmem:[%s1290_s5 + $0x30] sm:$0xff]  ;;  %p1053_p2 = scmp.ne.s32.totalorder %s682_s3, %s1052_s21  ;;  %p1057_p3 = scmp.lt.s32.totalorder %s682_s3, %s682_s3 }
  0x37   :  { %946 = vmatpush3.bf16.msra.mxu1 %v943_v16  ;;  %v975_v51 = vpack.c.bf16 %v478_v50, %v477_v49  ;;  %v480_v53 = vld [vmem:[%s1290_s5 + $0x38] sm:$0xff]  ;;  %v481_v55 = vld [vmem:[%s1290_s5 + $0x40] sm:$0xff]  ;;  %v482_v56 = vld [vmem:[%s1290_s5 + $0x48] sm:$0xff]  ;;  %p1058_p4 = scmp.lt.s32.totalorder %s1056_s22, %s1052_s21 }
  0x38   :  { %802 = vmatmul.mubr.msk.f32.gmra.mrb[4].mxu0 %vm79_vm0, %v59_v17  ;;  %948 = vmatprep.subr.bf16.mxu1 %v947_v21  ;;  %v979_v54 = vpack.c.bf16 %v480_v53, %v479_v52  ;;  %v983_v57 = vpack.c.bf16 %v482_v56, %v481_v55  ;;  %v483_v58 = vld [vmem:[%s1290_s5 + $0x50] sm:$0xff]  ;;  %v484_v59 = vld [vmem:[%s1290_s5 + $0x58] sm:$0xff]  ;;  %v485_v61 = vld [vmem:[%s1290_s5 + $0x60] sm:$0xff] }
  0x39   :  { %804 = vmatprep.mubr.msk.f32.mxu0 %vm79_vm0, %v60_v20  ;;  %968 = vmatprep.subr.bf16.mxu0 %v967_v46  ;;  %v987_v60 = vpack.c.bf16 %v484_v59, %v483_v58  ;;  %v486_v62 = vld [vmem:[%s1290_s5 + $0x68] sm:$0xff]  ;;  %v691_v0 = vld [vmem:[#allocation6] ss:$0 sm:$0xff]  ;;  %v487_v49 = vld [vmem:[%s1290_s5 + $0x70] sm:$0xff]  ;;  %p1059_p5 = por %p1058_p4, %p1057_p3 }
  0x3a   :  { %970 = vmatpush3.bf16.msra.mxu0 %v967_v46  ;;  %v991_v63 = vpack.c.bf16 %v486_v62, %v485_v61  ;;  %v488_v50 = vld [vmem:[%s1290_s5 + $0x78] sm:$0xff]  ;;  %v708_v52 = vld [vmem:[%s1289_s4] ss:$0 sm:$0xff] }
  0x3b   :  { %950 = vmatpush3.bf16.msra.mxu1 %v947_v21  ;;  %972 = vmatprep.subr.bf16.mxu0 %v971_v48  ;;  %p1060_p6 = pnand %p1059_p5, %p1053_p2 }
  0x3c   :  { %805 = vmatmul.mubr.msk.f32.gmra.mrb[6].mxu0 %vm79_vm0, %v61_v22  ;;  %952 = vmatprep.subr.bf16.mxu1 %v951_v26 }
  0x3d   :  { %807 = vmatprep.mubr.msk.f32.mxu0 %vm79_vm0, %v62_v25 }
  0x3e   :  { %974 = vmatpush3.bf16.msra.mxu0 %v971_v48 }
  0x3f   :  { %954 = vmatpush3.bf16.msra.mxu1 %v951_v26  ;;  %976 = vmatprep.subr.bf16.mxu0 %v975_v51 }
  0x40   :  { %808 = vmatmul.mubr.msk.f32.gmra.mrb[8].mxu0 %vm79_vm0, %v63_v27  ;;  %956 = vmatprep.subr.bf16.mxu1 %v955_v31 }
  0x41   :  { %810 = vmatprep.mubr.msk.f32.mxu0 %vm79_vm0, %v64_v30 }
  0x42   :  { %978 = vmatpush3.bf16.msra.mxu0 %v975_v51  ;;  %v995_v51 = vpack.c.bf16 %v488_v50, %v487_v49 }
  0x43   :  { %958 = vmatpush3.bf16.msra.mxu1 %v955_v31  ;;  %980 = vmatprep.subr.bf16.mxu0 %v979_v54 }
  0x44   :  { %811 = vmatmul.mubr.msk.f32.gmra.mrb[10].mxu0 %vm79_vm0, %v65_v32  ;;  %960 = vmatprep.subr.bf16.mxu1 %v959_v36 }
  0x45   :  { %813 = vmatprep.mubr.msk.f32.mxu0 %vm79_vm0, %v66_v35 }
  0x46   :  { %982 = vmatpush3.bf16.msra.mxu0 %v979_v54 }
  0x47   :  { %962 = vmatpush3.bf16.msra.mxu1 %v959_v36  ;;  %984 = vmatprep.subr.bf16.mxu0 %v983_v57 }
  0x48   :  { %814 = vmatmul.mubr.msk.f32.gmra.mrb[12].mxu0 %vm79_vm0, %v67_v37  ;;  %964 = vmatprep.subr.bf16.mxu1 %v963_v42 }
  0x49   :  { %816 = vmatprep.mubr.msk.f32.mxu0 %vm79_vm0, %v68_v38 }
  0x4a   :  { %986 = vmatpush3.bf16.msra.mxu0 %v983_v57 }
  0x4b   :  { %966 = vmatpush3.bf16.msra.mxu1 %v963_v42  ;;  %988 = vmatprep.subr.bf16.mxu0 %v987_v60 }
  0x4c   :  { %817 = vmatmul.mubr.msk.f32.gmra.mrb[14].mxu0 %vm79_vm0, %v69_v39 }
  0x4e   :  { %990 = vmatpush3.bf16.msra.mxu0 %v987_v60 }
  0x4f   :  { %992 = vmatprep.subr.bf16.mxu0 %v991_v63 }
  0x52   :  { %994 = vmatpush3.bf16.msra.mxu0 %v991_v63 }
  0x53   :  { %996 = vmatprep.subr.bf16.mxu0 %v995_v51 }
  0x56   :  { %998 = vmatpush3.bf16.msra.mxu0 %v995_v51 }
 0x103   :  { %v797_v1 = vpop.f32.mrb[0].mxu0 }
 0x104   :  { %v200_v2 = vadd.f32 %v797_v1, %v691_v0  ;;  %v194_v3 = vpop.f32.mrb[1].mxu0 }
 0x105   :  { %v195_v4 = vadd.f32 %v691_v0, %v194_v3 }
 0x106   :  { %v274_v7 = vmax.f32 %v200_v2, 0.0 }
 0x107   :  { %v800_v5 = vpop.f32.mrb[2].mxu0  ;;  %v273_v6 = vmax.f32 %v195_v4, 0.0 }
 0x108   :  { %v210_v8 = vadd.f32 %v800_v5, %v691_v0  ;;  %v204_v9 = vpop.f32.mrb[3].mxu0 }
 0x109   :  { %v205_v10 = vadd.f32 %v691_v0, %v204_v9  ;;  %851 = vmatprep.mubr.f32.mxu1 %v273_v6 }
 0x10a   :  { %v276_v11 = vmax.f32 %v210_v8, 0.0  ;;  %852 = vmatmul.mubr.f32.vlgmr.msra.gmra.mrb[0].mxu1 %v274_v7 }
 0x10b   :  { %v275_v12 = vmax.f32 %v205_v10, 0.0  ;;  %v803_v13 = vpop.f32.mrb[4].mxu0 }
 0x10c   :  { %v220_v14 = vadd.f32 %v803_v13, %v691_v0  ;;  %v214_v15 = vpop.f32.mrb[5].mxu0 }
 0x10d   :  { %854 = vmatprep.mubr.f32.mxu1 %v275_v12  ;;  %v215_v16 = vadd.f32 %v691_v0, %v214_v15 }
 0x10e   :  { %v278_v17 = vmax.f32 %v220_v14, 0.0  ;;  %855 = vmatmul.mubr.f32.gmra.mrb[2].mxu1 %v276_v11 }
 0x10f   :  { %v277_v18 = vmax.f32 %v215_v16, 0.0  ;;  %v806_v19 = vpop.f32.mrb[6].mxu0 }
 0x110   :  { %v230_v20 = vadd.f32 %v806_v19, %v691_v0  ;;  %v224_v21 = vpop.f32.mrb[7].mxu0 }
 0x111   :  { %857 = vmatprep.mubr.f32.mxu1 %v277_v18  ;;  %v225_v22 = vadd.f32 %v691_v0, %v224_v21 }
 0x112   :  { %858 = vmatmul.mubr.f32.gmra.mrb[4].mxu1 %v278_v17  ;;  %v280_v23 = vmax.f32 %v230_v20, 0.0 }
 0x113   :  { %v279_v24 = vmax.f32 %v225_v22, 0.0  ;;  %v809_v25 = vpop.f32.mrb[8].mxu0 }
 0x114   :  { %v240_v26 = vadd.f32 %v809_v25, %v691_v0  ;;  %v234_v27 = vpop.f32.mrb[9].mxu0 }
 0x115   :  { %860 = vmatprep.mubr.f32.mxu1 %v279_v24  ;;  %v235_v28 = vadd.f32 %v691_v0, %v234_v27 }
 0x116   :  { %861 = vmatmul.mubr.f32.gmra.mrb[6].mxu1 %v280_v23  ;;  %v282_v29 = vmax.f32 %v240_v26, 0.0 }
 0x117   :  { %v281_v30 = vmax.f32 %v235_v28, 0.0  ;;  %v812_v31 = vpop.f32.mrb[10].mxu0 }
 0x118   :  { %v250_v32 = vadd.f32 %v812_v31, %v691_v0  ;;  %v244_v33 = vpop.f32.mrb[11].mxu0 }
 0x119   :  { %863 = vmatprep.mubr.f32.mxu1 %v281_v30  ;;  %v245_v34 = vadd.f32 %v691_v0, %v244_v33 }
 0x11a   :  { %864 = vmatmul.mubr.f32.gmra.mrb[8].mxu1 %v282_v29  ;;  %v284_v35 = vmax.f32 %v250_v32, 0.0 }
 0x11b   :  { %v283_v36 = vmax.f32 %v245_v34, 0.0  ;;  %v815_v37 = vpop.f32.mrb[12].mxu0 }
 0x11c   :  { %v260_v38 = vadd.f32 %v815_v37, %v691_v0  ;;  %v254_v39 = vpop.f32.mrb[13].mxu0 }
 0x11d   :  { %866 = vmatprep.mubr.f32.mxu1 %v283_v36  ;;  %v255_v40 = vadd.f32 %v691_v0, %v254_v39 }
 0x11e   :  { %867 = vmatmul.mubr.f32.gmra.mrb[10].mxu1 %v284_v35  ;;  %v286_v41 = vmax.f32 %v260_v38, 0.0 }
 0x11f   :  { %v285_v42 = vmax.f32 %v255_v40, 0.0  ;;  %v818_v43 = vpop.f32.mrb[14].mxu0 }
 0x120   :  { %v270_v44 = vadd.f32 %v818_v43, %v691_v0  ;;  %v264_v45 = vpop.f32.mrb[15].mxu0 }
 0x121   :  { %869 = vmatprep.mubr.f32.mxu1 %v285_v42  ;;  %v265_v46 = vadd.f32 %v691_v0, %v264_v45 }
 0x122   :  { %870 = vmatmul.mubr.f32.gmra.mrb[12].mxu1 %v286_v41  ;;  %v288_v47 = vmax.f32 %v270_v44, 0.0 }
 0x123   :  { %v287_v48 = vmax.f32 %v265_v46, 0.0 }
 0x125   :  { %872 = vmatprep.mubr.f32.mxu1 %v287_v48 }
 0x126   :  { %873 = vmatmul.mubr.f32.gmra.mrb[14].mxu1 %v288_v47 }
 0x1dd   :  { %v853_v53 = vpop.f32.mrb[0].mxu1 }
 0x1de   :  { %v384_v54 = vadd.f32 %v853_v53, %v708_v52  ;;  %v378_v55 = vpop.f32.mrb[1].mxu1  ;;  %v667_v53 = vstv %s1291_s6 }
 0x1df   :  { %v379_v56 = vadd.f32 %v708_v52, %v378_v55 }
 0x1e0   :  { %v458_v59 = vmax.f32 %v384_v54, 0.0 }
 0x1e1   :  { %v457_v57 = vmax.f32 %v379_v56, 0.0  ;;  %v856_v58 = vpop.f32.mrb[2].mxu1 }
 0x1e2   :  { %v394_v60 = vadd.f32 %v856_v58, %v708_v52  ;;  %v388_v61 = vpop.f32.mrb[3].mxu1 }
 0x1e3   :  { %v389_v62 = vadd.f32 %v708_v52, %v388_v61  ;;  %907 = vmatprep.mubr.f32.mxu0 %v457_v57 }
 0x1e4   :  { %v460_v63 = vmax.f32 %v394_v60, 0.0  ;;  %908 = vmatmul.mubr.f32.vlgmr.msra.gmra.mrb[16].mxu0 %v458_v59 }
 0x1e5   :  { %v459_v0 = vmax.f32 %v389_v62, 0.0  ;;  %v859_v1 = vpop.f32.mrb[4].mxu1 }
 0x1e6   :  { %v404_v2 = vadd.f32 %v859_v1, %v708_v52  ;;  %v398_v3 = vpop.f32.mrb[5].mxu1 }
 0x1e7   :  { %910 = vmatprep.mubr.f32.mxu0 %v459_v0  ;;  %v399_v4 = vadd.f32 %v708_v52, %v398_v3 }
 0x1e8   :  { %v462_v5 = vmax.f32 %v404_v2, 0.0  ;;  %911 = vmatmul.mubr.f32.gmra.mrb[18].mxu0 %v460_v63 }
 0x1e9   :  { %v461_v6 = vmax.f32 %v399_v4, 0.0  ;;  %v862_v7 = vpop.f32.mrb[6].mxu1 }
 0x1ea   :  { %v414_v8 = vadd.f32 %v862_v7, %v708_v52  ;;  %v408_v9 = vpop.f32.mrb[7].mxu1 }
 0x1eb   :  { %913 = vmatprep.mubr.f32.mxu0 %v461_v6  ;;  %v409_v10 = vadd.f32 %v708_v52, %v408_v9 }
 0x1ec   :  { %914 = vmatmul.mubr.f32.gmra.mrb[20].mxu0 %v462_v5  ;;  %v464_v11 = vmax.f32 %v414_v8, 0.0 }
 0x1ed   :  { %v463_v12 = vmax.f32 %v409_v10, 0.0  ;;  %v865_v13 = vpop.f32.mrb[8].mxu1 }
 0x1ee   :  { %v424_v14 = vadd.f32 %v865_v13, %v708_v52  ;;  %v418_v15 = vpop.f32.mrb[9].mxu1 }
 0x1ef   :  { %916 = vmatprep.mubr.f32.mxu0 %v463_v12  ;;  %v419_v16 = vadd.f32 %v708_v52, %v418_v15 }
 0x1f0   :  { %917 = vmatmul.mubr.f32.gmra.mrb[22].mxu0 %v464_v11  ;;  %v466_v17 = vmax.f32 %v424_v14, 0.0 }
 0x1f1   :  { %v465_v18 = vmax.f32 %v419_v16, 0.0  ;;  %v868_v19 = vpop.f32.mrb[10].mxu1 }
 0x1f2   :  { %v434_v20 = vadd.f32 %v868_v19, %v708_v52  ;;  %v428_v21 = vpop.f32.mrb[11].mxu1 }
 0x1f3   :  { %919 = vmatprep.mubr.f32.mxu0 %v465_v18  ;;  %v429_v22 = vadd.f32 %v708_v52, %v428_v21 }
 0x1f4   :  { %920 = vmatmul.mubr.f32.gmra.mrb[24].mxu0 %v466_v17  ;;  %v468_v23 = vmax.f32 %v434_v20, 0.0 }
 0x1f5   :  { %v467_v24 = vmax.f32 %v429_v22, 0.0  ;;  %v871_v25 = vpop.f32.mrb[12].mxu1 }
 0x1f6   :  { %v444_v26 = vadd.f32 %v871_v25, %v708_v52  ;;  %v438_v27 = vpop.f32.mrb[13].mxu1 }
 0x1f7   :  { %922 = vmatprep.mubr.f32.mxu0 %v467_v24  ;;  %v439_v28 = vadd.f32 %v708_v52, %v438_v27 }
 0x1f8   :  { %923 = vmatmul.mubr.f32.gmra.mrb[26].mxu0 %v468_v23  ;;  %v470_v29 = vmax.f32 %v444_v26, 0.0 }
 0x1f9   :  { %v469_v30 = vmax.f32 %v439_v28, 0.0  ;;  %v874_v31 = vpop.f32.mrb[14].mxu1 }
 0x1fa   :  { %v454_v32 = vadd.f32 %v874_v31, %v708_v52  ;;  %v448_v33 = vpop.f32.mrb[15].mxu1 }
 0x1fb   :  { %925 = vmatprep.mubr.f32.mxu0 %v469_v30  ;;  %v449_v34 = vadd.f32 %v708_v52, %v448_v33 }
 0x1fc   :  { %926 = vmatmul.mubr.f32.gmra.mrb[28].mxu0 %v470_v29  ;;  %v472_v35 = vmax.f32 %v454_v32, 0.0 }
 0x1fd   :  { %v471_v36 = vmax.f32 %v449_v34, 0.0 }
 0x1ff   :  { %928 = vmatprep.mubr.f32.mxu0 %v471_v36 }
 0x200   :  { %929 = vmatmul.mubr.f32.gmra.mrb[30].mxu0 %v472_v35 }
 0x2b7   :  { %v909_v37 = vpop.f32.mrb[16].mxu0 }
 0x2b8   :  { %v555_v38 = vpop.f32.mrb[17].mxu0 }
 0x2b9   :  { %634 = vxpose.xlu0.b32.start [1/16] (narrow) %v555_v38, 8 }
 0x2bb   :  { %v912_v39 = vpop.f32.mrb[18].mxu0 }
 0x2bc   :  { %v565_v40 = vpop.f32.mrb[19].mxu0 }
 0x2bd   :  { %635 = vxpose.xlu0.b32.cont [2/16] (narrow) %v909_v37, 8 }
 0x2bf   :  { %v915_v41 = vpop.f32.mrb[20].mxu0 }
 0x2c0   :  { %v575_v42 = vpop.f32.mrb[21].mxu0 }
 0x2c1   :  { %636 = vxpose.xlu0.b32.cont [3/16] (narrow) %v565_v40, 8 }
 0x2c3   :  { %v918_v43 = vpop.f32.mrb[22].mxu0 }
 0x2c4   :  { %v585_v44 = vpop.f32.mrb[23].mxu0 }
 0x2c5   :  { %637 = vxpose.xlu0.b32.cont [4/16] (narrow) %v912_v39, 8 }
 0x2c7   :  { %v921_v45 = vpop.f32.mrb[24].mxu0 }
 0x2c8   :  { %v595_v46 = vpop.f32.mrb[25].mxu0 }
 0x2c9   :  { %638 = vxpose.xlu0.b32.cont [5/16] (narrow) %v575_v42, 8 }
 0x2cb   :  { %v924_v47 = vpop.f32.mrb[26].mxu0 }
 0x2cc   :  { %v605_v48 = vpop.f32.mrb[27].mxu0 }
 0x2cd   :  { %639 = vxpose.xlu0.b32.cont [6/16] (narrow) %v915_v41, 8 }
 0x2cf   :  { %v927_v49 = vpop.f32.mrb[28].mxu0 }
 0x2d0   :  { %v615_v50 = vpop.f32.mrb[29].mxu0 }
 0x2d1   :  { %640 = vxpose.xlu0.b32.cont [7/16] (narrow) %v585_v44, 8 }
 0x2d3   :  { %v930_v51 = vpop.f32.mrb[30].mxu0 }
 0x2d4   :  { %v625_v52 = vpop.f32.mrb[31].mxu0 }
 0x2d5   :  { %641 = vxpose.xlu0.b32.cont [8/16] (narrow) %v918_v43, 8 }
 0x2d9   :  { %642 = vxpose.xlu0.b32.cont [9/16] (narrow) %v595_v46, 8 }
 0x2dd   :  { %643 = vxpose.xlu0.b32.cont [10/16] (narrow) %v921_v45, 8 }
 0x2e1   :  { %644 = vxpose.xlu0.b32.cont [11/16] (narrow) %v605_v48, 8 }
 0x2e5   :  { %645 = vxpose.xlu0.b32.cont [12/16] (narrow) %v924_v47, 8 }
 0x2e9   :  { %646 = vxpose.xlu0.b32.cont [13/16] (narrow) %v615_v50, 8 }
 0x2ed   :  { %647 = vxpose.xlu0.b32.cont [14/16] (narrow) %v927_v49, 8 }
 0x2f1   :  { %648 = vxpose.xlu0.b32.cont [15/16] (narrow) %v625_v52, 8 }
 0x2f5   :  { %649 = vxpose.xlu0.b32.end [16/16] (narrow) %v930_v51, 8 }
 0x339   :  { %v650_v54 = vpop.trf.xlu0 }
 0x33a   :  { %v668_v55 = vadd.f32 %v667_v53, %v650_v54 }
 0x33c   :  { %v669_v56 = vsub.f32 0.0, %v668_v55 }
 0x33e   :  { %v670_v57 = vmul.f32 1.442695, %v669_v56 }
 0x340   :  { %1004 = vpow2.f32 %v670_v57 }
 0x34a   :  { %v1005_v58 = vpop.eup %1004 }
 0x34b   :  { %v672_v59 = vadd.f32 1.0, %v1005_v58 }
 0x34d   :  { %1006 = vrcp.f32 %v672_v59 }
 0x357   :  { %v1007_v60 = vpop.eup %1006 }
 0x358   :  { %674 = vst [vmem:[#allocation8] sm:$0x1] %v1007_v60 }
 0x359   :  { %1063 = shalt.err (!%p1060_p6)
}
 0x35a   :  { %s1064_s24 = scalar_lea.hbm %s1292_s7, 16 }
 0x35b   :  { %p1065_p7 = scmp.ne.s32.totalorder %s1292_s7, %s1064_s24  ;;  %p1068_p8 = scmp.lt.u32.totalorder %s1064_s24, %s1292_s7 }
 0x35d   :  { %p1070_p9 = pnand %p1068_p8, %p1065_p7 }
 0x35f   :  { %1073 = shalt.err (!%p1070_p9)
}
 0x360   :  { %684 = dma.vmem_to_hbm [thread:$0]  %s682_s3, 16, %s1292_s7, [#allocation5]  }
 0x361   :  { %1078 = dma.done.wait [#allocation5], 16  }
 0x362   :  { %1079 = vsyncadd [#allocation5], 4294967280 }
 0x363   :  { %688 = vsyncpa [#allocation4], 1 }
 0x364   :  { %689 = vsyncpa [#allocation7], 1 }
 0x365   :  { %690 = vsyncpa [#allocation5], 1 }

</bundles_post_ra>
